<compile_context>
chip_gen: v7x
topology: tpu7x:2x2x1
jax: 0.10.0
libtpu: 0.0.40
codegen_flags: <defaults>
</compile_context>

<pallas_src>
import functools

import jax
import jax.numpy as jnp
from jax.experimental import pallas as pl
from jax.experimental.pallas import tpu as pltpu

EPS = 1e-6          # matches utils.basic.reduce_masked_mean's EPS
LANES = 128
SUBLANES = 8


def _loss_terms(x, y, v, pw):
    """Numerically-stable BCE-with-logits with pos_weight (PyTorch semantics):
         loss = (1 - y) * x + (1 + (pw - 1) * y) * softplus(-x)
         softplus(-x) = log1p(exp(-|x|)) + max(-x, 0)
    Returns (loss * v, v)."""
    sp = jnp.log1p(jnp.exp(-jnp.abs(x))) + jnp.maximum(-x, 0.0)
    loss = (1.0 - y) * x + (1.0 + (pw - 1.0) * y) * sp
    return loss * v, v


def _bce_masked_sum_kernel(pw_ref, yp_ref, yt_ref, v_ref,
                           num_ref, den_ref, acc_num, acc_den, *,
                           tiles_per_core, tile_r, rows, num_tiles, need_mask):
    """Grid = (core, tile).  Each core accumulates sum(loss*valid) and
    sum(valid) per (sublane, lane) into a single-vreg (8,128) accumulator and
    writes its partial result at its last tile."""
    c = pl.program_id(0)
    i = pl.program_id(1)

    @pl.when(i == 0)
    def _():
        acc_num[...] = jnp.zeros_like(acc_num)
        acc_den[...] = jnp.zeros_like(acc_den)

    x = yp_ref[...].astype(jnp.float32)      # in-kernel cast: inputs stream in
    y = yt_ref[...].astype(jnp.float32)      # their native (possibly narrow)
    v = v_ref[...].astype(jnp.float32)       # dtypes
    pw = pw_ref[0, 0]

    num_c, den_c = _loss_terms(x, y, v, pw)

    def _accumulate(nc, dc):
        # (tile_r,128) -> (tile_r//8, 8, 128) is a tile-boundary reshape; the
        # sum over axis 0 is vreg-wise VALU adds only (no cross-lane work).
        acc_num[...] += jnp.sum(nc.reshape(-1, SUBLANES, LANES), axis=0)
        acc_den[...] += jnp.sum(dc.reshape(-1, SUBLANES, LANES), axis=0)

    if need_mask:
        # Only the last real tile (possibly partial) and duplicated clamped
        # tiles (unclamped index >= num_tiles) need masking; all other tiles
        # take the select-free hot path.
        t = c * tiles_per_core + i                       # unclamped tile index

        @pl.when(t < num_tiles - 1)
        def _():
            _accumulate(num_c, den_c)

        @pl.when(t >= num_tiles - 1)
        def _():
            row0 = t * tile_r
            local = jax.lax.broadcasted_iota(jnp.int32, (tile_r, LANES), 0)
            in_bounds = (row0 + local) < rows
            # jnp.where (select) so garbage OOB rows cannot leak NaN/Inf.
            _accumulate(jnp.where(in_bounds, num_c, 0.0),
                        jnp.where(in_bounds, den_c, 0.0))
    else:
        _accumulate(num_c, den_c)

    @pl.when(i == pl.num_programs(1) - 1)
    def _():
        num_ref[...] = acc_num[...].reshape(1, SUBLANES, LANES)
        den_ref[...] = acc_den[...].reshape(1, SUBLANES, LANES)


def _tpu_generation_params():
    """(max tile rows, core partials, vmem_limit_bytes) per TPU generation."""
    try:
        kind = jax.devices()[0].device_kind.lower()
    except Exception:
        kind = ""
    if "v7" in kind:
        # 2 TensorCores/chip and ~3.2 TB/s HBM: bigger blocks + split the row
        # range across both cores.  24 MiB of double-buffered f32 inputs needs
        # an explicit (but < 64 MiB physical) scoped-VMEM limit for headroom.
        return 8192, 2, 40 * 1024 * 1024
    # v5e / v6e: single TensorCore.  4096-row blocks (12 MiB double-buffered
    # f32 inputs + a vreg of scratch) fit even v5e's 16 MiB default limit.
    return 4096, 1, None


def _masked_sums_jax(x, y, v, pos_weight):
    nc, dc = _loss_terms(x.astype(jnp.float32), y.astype(jnp.float32),
                         v.astype(jnp.float32), jnp.float32(pos_weight))
    return jnp.sum(nc), jnp.sum(dc)


def simple_loss(ypred, ytgt, valid, pos_weight):
    """Pallas implementation of SimpleLoss.forward.  Returns a scalar float32.

    Callers should pass inputs in their native dtype (bf16 logits / int8 or
    bool `valid` are cheaper: the kernel is HBM-bandwidth bound and casts
    in-kernel) — do NOT pre-cast to float32."""
    total = ypred.size
    chunk = SUBLANES * LANES                     # 1024
    main = (total // chunk) * chunk              # kernel part (multiple of 1024)
    tail = total - main                          # < 1024 elems -> plain JAX

    fp = ypred.reshape(-1)                       # layout-preserving flatten
    ft = ytgt.reshape(-1)
    fv = valid.reshape(-1)

    numer = jnp.float32(0.0)
    denom = jnp.float32(0.0)

    if main:
        R = main // LANES                        # rows, multiple of 8
        max_tile_r, max_cores, vmem_limit = _tpu_generation_params()
        # tile_r is either the full row count (legal block for any dtype) or
        # max_tile_r (a multiple of 32, legal for f32/bf16/int8 tiling).
        tile_r = R if R <= max_tile_r else max_tile_r
        num_tiles = pl.cdiv(R, tile_r)
        ncores = max_cores if num_tiles >= 2 else 1
        tiles_per_core = pl.cdiv(num_tiles, ncores)
        need_mask = (ncores * tiles_per_core * tile_r) != R

        def in_map(c, i):
            # Clamp so DMAs never start fully out of bounds; duplicated
            # (clamped) tiles are zeroed in-kernel via the row mask.
            return (jnp.minimum(c * tiles_per_core + i, num_tiles - 1), 0)

        kernel = functools.partial(
            _bce_masked_sum_kernel,
            tiles_per_core=tiles_per_core, tile_r=tile_r,
            rows=R, num_tiles=num_tiles, need_mask=need_mask)

        yp2d = fp[:main].reshape(R, LANES)       # native dtype: no pad, no cast
        yt2d = ft[:main].reshape(R, LANES)
        v2d = fv[:main].reshape(R, LANES)
        pw_arr = jnp.full((1, 1), pos_weight, dtype=jnp.float32)

        bytes_in = main * (yp2d.dtype.itemsize + yt2d.dtype.itemsize
                           + v2d.dtype.itemsize)
        cost = pl.CostEstimate(
            flops=12 * main,
            transcendentals=2 * main,
            bytes_accessed=bytes_in + 2 * ncores * SUBLANES * LANES * 4)

        num_part, den_part = pl.pallas_call(
            kernel,
            out_shape=(
                jax.ShapeDtypeStruct((ncores, SUBLANES, LANES), jnp.float32),
                jax.ShapeDtypeStruct((ncores, SUBLANES, LANES), jnp.float32)),
            grid_spec=pltpu.PrefetchScalarGridSpec(
                num_scalar_prefetch=0,
                grid=(ncores, tiles_per_core),
                in_specs=[
                    pl.BlockSpec(memory_space=pltpu.SMEM),      # pos_weight
                    pl.BlockSpec((tile_r, LANES), in_map),      # ypred
                    pl.BlockSpec((tile_r, LANES), in_map),      # ytgt
                    pl.BlockSpec((tile_r, LANES), in_map),      # valid
                ],
                out_specs=[
                    pl.BlockSpec((1, SUBLANES, LANES), lambda c, i: (c, 0, 0)),
                    pl.BlockSpec((1, SUBLANES, LANES), lambda c, i: (c, 0, 0)),
                ],
                scratch_shapes=[pltpu.VMEM((SUBLANES, LANES), jnp.float32),
                                pltpu.VMEM((SUBLANES, LANES), jnp.float32)],
            ),
            compiler_params=pltpu.CompilerParams(
                dimension_semantics=("parallel", "arbitrary"),
                vmem_limit_bytes=vmem_limit),
            cost_estimate=cost,
        )(pw_arr, yp2d, yt2d, v2d)

        numer = numer + jnp.sum(num_part)
        denom = denom + jnp.sum(den_part)

    if tail:
        # <1024-element remainder handled in plain JAX (much cheaper than a
        # full-array jnp.pad copy of each memory-bound input stream).
        tn, td = _masked_sums_jax(fp[main:], ft[main:], fv[main:], pos_weight)
        numer = numer + tn
        denom = denom + td

    return numer / (denom + EPS)


def _reference(ypred, ytgt, valid, pos_weight):
    x = ypred.astype(jnp.float32)
    y = ytgt.astype(jnp.float32)
    v = valid.astype(jnp.float32)
    sp = jnp.log1p(jnp.exp(-jnp.abs(x))) + jnp.maximum(-x, 0.0)
    loss = (1.0 - y) * x + (1.0 + (pos_weight - 1.0) * y) * sp
    return jnp.sum(loss * v) / (EPS + jnp.sum(v))


if __name__ == "__main__":
    key = jax.random.PRNGKey(0)
    k1, k2, k3 = jax.random.split(key, 3)

    B, C, H, W = 2, 4, 16, 16                     # NCHW, small synthetic shapes
    pos_weight = 2.13                             # module init arg

    ypred = jax.random.normal(k1, (B, C, H, W), dtype=jnp.float32) * 2.0
    ytgt = (jax.random.uniform(k2, (B, C, H, W)) > 0.5).astype(jnp.float32)
    valid = (jax.random.uniform(k3, (B, C, H, W)) > 0.3).astype(jnp.float32)

    # f32 path (matches the PyTorch module exactly).
    out = jax.block_until_ready(simple_loss(ypred, ytgt, valid, pos_weight))
    ref = _reference(ypred, ytgt, valid, pos_weight)
    assert jnp.allclose(out, ref, rtol=1e-5, atol=1e-5), (out, ref)

    # Narrow-dtype path (the bandwidth win): bf16 logits/targets, int8 valid.
    yp_bf = ypred.astype(jnp.bfloat16)
    yt_bf = ytgt.astype(jnp.bfloat16)
    v_i8 = valid.astype(jnp.int8)
    out_n = jax.block_until_ready(simple_loss(yp_bf, yt_bf, v_i8, pos_weight))
    ref_n = _reference(yp_bf, yt_bf, v_i8, pos_weight)
    assert jnp.allclose(out_n, ref_n, rtol=1e-5, atol=1e-5), (out_n, ref_n)

    print("KERNEL_OK")
</pallas_src>

<mosaic_0001>
module attributes {stable_mosaic.version = 11 : i64} {
  func.func @_bce_masked_sum_kernel(%arg0: i32, %arg1: i32, %arg2: memref<1x1xf32, #tpu.memory_space<smem>>, %arg3: memref<16x128xf32, #tpu.memory_space<vmem>>, %arg4: memref<16x128xf32, #tpu.memory_space<vmem>>, %arg5: memref<16x128xf32, #tpu.memory_space<vmem>>, %arg6: memref<1x8x128xf32, #tpu.memory_space<vmem>>, %arg7: memref<1x8x128xf32, #tpu.memory_space<vmem>>, %arg8: memref<8x128xf32, #tpu.memory_space<vmem>>, %arg9: memref<8x128xf32, #tpu.memory_space<vmem>>) attributes {dimension_semantics = [#tpu.dimension_semantics<parallel>, #tpu.dimension_semantics<arbitrary>], iteration_bounds = array<i64: 1, 1>, scalar_prefetch = 0 : i64, scratch_operands = 2 : i64, tpu.core_type = #tpu.core_type<tc>, window_params = [{transform_indices = @transform_0, window_bounds = array<i64: 1, 1>}, {transform_indices = @transform_1, window_bounds = array<i64: 16, 128>}, {transform_indices = @transform_2, window_bounds = array<i64: 16, 128>}, {transform_indices = @transform_3, window_bounds = array<i64: 16, 128>}, {transform_indices = @transform_4, window_bounds = array<i64: 1, 8, 128>}, {transform_indices = @transform_5, window_bounds = array<i64: 1, 8, 128>}]} {
    %c0_i32 = arith.constant 0 : i32
    %0 = arith.cmpi eq, %arg1, %c0_i32 : i32
    %1 = arith.extui %0 : i1 to i32
    %c0_i32_0 = arith.constant 0 : i32
    %2 = arith.cmpi ne, %1, %c0_i32_0 : i32
    scf.if %2 {
      %cst_25 = arith.constant 0.000000e+00 : f32
      %41 = vector.broadcast %cst_25 : f32 to vector<8x128xf32>
      %c0_26 = arith.constant 0 : index
      %c0_27 = arith.constant 0 : index
      %42 = vector.load %arg8[%c0_26, %c0_27] : memref<8x128xf32, #tpu.memory_space<vmem>>, vector<8x128xf32>
      tpu.vector_store %arg8[%c0_26, %c0_27], %41 {strides = array<i32>} : memref<8x128xf32, #tpu.memory_space<vmem>>, vector<8x128xf32>,
      %cst_28 = arith.constant 0.000000e+00 : f32
      %43 = vector.broadcast %cst_28 : f32 to vector<8x128xf32>
      %c0_29 = arith.constant 0 : index
      %c0_30 = arith.constant 0 : index
      %44 = vector.load %arg9[%c0_29, %c0_30] : memref<8x128xf32, #tpu.memory_space<vmem>>, vector<8x128xf32>
      tpu.vector_store %arg9[%c0_29, %c0_30], %43 {strides = array<i32>} : memref<8x128xf32, #tpu.memory_space<vmem>>, vector<8x128xf32>,
    } else {
    }
    %c0 = arith.constant 0 : index
    %c0_1 = arith.constant 0 : index
    %3 = vector.load %arg3[%c0, %c0_1] : memref<16x128xf32, #tpu.memory_space<vmem>>, vector<16x128xf32>
    %c0_2 = arith.constant 0 : index
    %c0_3 = arith.constant 0 : index
    %4 = vector.load %arg4[%c0_2, %c0_3] : memref<16x128xf32, #tpu.memory_space<vmem>>, vector<16x128xf32>
    %c0_4 = arith.constant 0 : index
    %c0_5 = arith.constant 0 : index
    %5 = vector.load %arg5[%c0_4, %c0_5] : memref<16x128xf32, #tpu.memory_space<vmem>>, vector<16x128xf32>
    %c0_6 = arith.constant 0 : index
    %c0_7 = arith.constant 0 : index
    %6 = memref.load %arg2[%c0_6, %c0_7] : memref<1x1xf32, #tpu.memory_space<smem>>
    %7 = math.absf %3 : vector<16x128xf32>
    %cst = arith.constant 0.000000e+00 : f32
    %8 = vector.broadcast %cst : f32 to vector<16x128xf32>
    %9 = arith.subf %8, %7 : vector<16x128xf32>
    %10 = math.exp %9 : vector<16x128xf32>
    %11 = math.log1p %10 : vector<16x128xf32>
    %cst_8 = arith.constant 0.000000e+00 : f32
    %12 = vector.broadcast %cst_8 : f32 to vector<16x128xf32>
    %13 = arith.subf %12, %3 : vector<16x128xf32>
    %cst_9 = arith.constant 0.000000e+00 : f32
    %14 = vector.broadcast %cst_9 : f32 to vector<16x128xf32>
    %15 = arith.maximumf %13, %14 : vector<16x128xf32>
    %16 = arith.addf %11, %15 : vector<16x128xf32>
    %cst_10 = arith.constant 1.000000e+00 : f32
    %17 = vector.broadcast %cst_10 : f32 to vector<16x128xf32>
    %18 = arith.subf %17, %4 : vector<16x128xf32>
    %19 = arith.mulf %18, %3 : vector<16x128xf32>
    %cst_11 = arith.constant 1.000000e+00 : f32
    %20 = arith.subf %6, %cst_11 : f32
    %21 = vector.broadcast %20 : f32 to vector<16x128xf32>
    %22 = arith.mulf %21, %4 : vector<16x128xf32>
    %cst_12 = arith.constant 1.000000e+00 : f32
    %23 = vector.broadcast %cst_12 : f32 to vector<16x128xf32>
    %24 = arith.addf %23, %22 : vector<16x128xf32>
    %25 = arith.mulf %24, %16 : vector<16x128xf32>
    %26 = arith.addf %19, %25 : vector<16x128xf32>
    %27 = arith.mulf %26, %5 : vector<16x128xf32>
    %c0_13 = arith.constant 0 : index
    %c0_14 = arith.constant 0 : index
    %28 = vector.load %arg8[%c0_13, %c0_14] : memref<8x128xf32, #tpu.memory_space<vmem>>, vector<8x128xf32>
    %29 = vector.shape_cast %27 : vector<16x128xf32> to vector<2x8x128xf32>
    %cst_15 = arith.constant dense<0.000000e+00> : vector<8x128xf32>
    %30 = vector.multi_reduction <add>, %29, %cst_15 [0] : vector<2x8x128xf32> to vector<8x128xf32>
    %31 = arith.addf %28, %30 : vector<8x128xf32>
    %c0_16 = arith.constant 0 : index
    %c0_17 = arith.constant 0 : index
    %32 = vector.load %arg8[%c0_16, %c0_17] : memref<8x128xf32, #tpu.memory_space<vmem>>, vector<8x128xf32>
    tpu.vector_store %arg8[%c0_16, %c0_17], %31 {strides = array<i32>} : memref<8x128xf32, #tpu.memory_space<vmem>>, vector<8x128xf32>,
    %c0_18 = arith.constant 0 : index
    %c0_19 = arith.constant 0 : index
    %33 = vector.load %arg9[%c0_18, %c0_19] : memref<8x128xf32, #tpu.memory_space<vmem>>, vector<8x128xf32>
    %34 = vector.shape_cast %5 : vector<16x128xf32> to vector<2x8x128xf32>
    %cst_20 = arith.constant dense<0.000000e+00> : vector<8x128xf32>
    %35 = vector.multi_reduction <add>, %34, %cst_20 [0] : vector<2x8x128xf32> to vector<8x128xf32>
    %36 = arith.addf %33, %35 : vector<8x128xf32>
    %c0_21 = arith.constant 0 : index
    %c0_22 = arith.constant 0 : index
    %37 = vector.load %arg9[%c0_21, %c0_22] : memref<8x128xf32, #tpu.memory_space<vmem>>, vector<8x128xf32>
    tpu.vector_store %arg9[%c0_21, %c0_22], %36 {strides = array<i32>} : memref<8x128xf32, #tpu.memory_space<vmem>>, vector<8x128xf32>,
    %c0_i32_23 = arith.constant 0 : i32
    %38 = arith.cmpi eq, %arg1, %c0_i32_23 : i32
    %39 = arith.extui %38 : i1 to i32
    %c0_i32_24 = arith.constant 0 : i32
    %40 = arith.cmpi ne, %39, %c0_i32_24 : i32
    scf.if %40 {
      %c0_25 = arith.constant 0 : index
      %c0_26 = arith.constant 0 : index
      %41 = vector.load %arg8[%c0_25, %c0_26] : memref<8x128xf32, #tpu.memory_space<vmem>>, vector<8x128xf32>
      %42 = vector.shape_cast %41 : vector<8x128xf32> to vector<1x8x128xf32>
      %c0_27 = arith.constant 0 : index
      %c0_28 = arith.constant 0 : index
      %c0_29 = arith.constant 0 : index
      %43 = vector.load %arg6[%c0_27, %c0_28, %c0_29] : memref<1x8x128xf32, #tpu.memory_space<vmem>>, vector<1x8x128xf32>
      tpu.vector_store %arg6[%c0_27, %c0_28, %c0_29], %42 {strides = array<i32>} : memref<1x8x128xf32, #tpu.memory_space<vmem>>, vector<1x8x128xf32>,
      %c0_30 = arith.constant 0 : index
      %c0_31 = arith.constant 0 : index
      %44 = vector.load %arg9[%c0_30, %c0_31] : memref<8x128xf32, #tpu.memory_space<vmem>>, vector<8x128xf32>
      %45 = vector.shape_cast %44 : vector<8x128xf32> to vector<1x8x128xf32>
      %c0_32 = arith.constant 0 : index
      %c0_33 = arith.constant 0 : index
      %c0_34 = arith.constant 0 : index
      %46 = vector.load %arg7[%c0_32, %c0_33, %c0_34] : memref<1x8x128xf32, #tpu.memory_space<vmem>>, vector<1x8x128xf32>
      tpu.vector_store %arg7[%c0_32, %c0_33, %c0_34], %45 {strides = array<i32>} : memref<1x8x128xf32, #tpu.memory_space<vmem>>, vector<1x8x128xf32>,
    } else {
    }
    return
  }
  func.func @transform_0(%arg0: i32, %arg1: i32) -> (i32, i32) {
    %c0_i32 = arith.constant 0 : i32
    %c0_i32_0 = arith.constant 0 : i32
    %c0_i32_1 = arith.constant 0 : i32
    return %c0_i32, %c0_i32_0 : i32, i32
  }
  func.func @transform_1(%arg0: i32, %arg1: i32) -> (i32, i32) {
    %c1_i32 = arith.constant 1 : i32
    %0 = arith.muli %arg0, %c1_i32 : i32
    %1 = arith.addi %0, %arg1 : i32
    %c0_i32 = arith.constant 0 : i32
    %2 = arith.minsi %1, %c0_i32 : i32
    %c0_i32_0 = arith.constant 0 : i32
    %c0_i32_1 = arith.constant 0 : i32
    return %2, %c0_i32_0 : i32, i32
  }
  func.func @transform_2(%arg0: i32, %arg1: i32) -> (i32, i32) {
    %c1_i32 = arith.constant 1 : i32
    %0 = arith.muli %arg0, %c1_i32 : i32
    %1 = arith.addi %0, %arg1 : i32
    %c0_i32 = arith.constant 0 : i32
    %2 = arith.minsi %1, %c0_i32 : i32
    %c0_i32_0 = arith.constant 0 : i32
    %c0_i32_1 = arith.constant 0 : i32
    return %2, %c0_i32_0 : i32, i32
  }
  func.func @transform_3(%arg0: i32, %arg1: i32) -> (i32, i32) {
    %c1_i32 = arith.constant 1 : i32
    %0 = arith.muli %arg0, %c1_i32 : i32
    %1 = arith.addi %0, %arg1 : i32
    %c0_i32 = arith.constant 0 : i32
    %2 = arith.minsi %1, %c0_i32 : i32
    %c0_i32_0 = arith.constant 0 : i32
    %c0_i32_1 = arith.constant 0 : i32
    return %2, %c0_i32_0 : i32, i32
  }
  func.func @transform_4(%arg0: i32, %arg1: i32) -> (i32, i32, i32) {
    %c0_i32 = arith.constant 0 : i32
    %c0_i32_0 = arith.constant 0 : i32
    %c0_i32_1 = arith.constant 0 : i32
    return %arg0, %c0_i32, %c0_i32_0 : i32, i32, i32
  }
  func.func @transform_5(%arg0: i32, %arg1: i32) -> (i32, i32, i32) {
    %c0_i32 = arith.constant 0 : i32
    %c0_i32_0 = arith.constant 0 : i32
    %c0_i32_1 = arith.constant 0 : i32
    return %arg0, %c0_i32, %c0_i32_0 : i32, i32, i32
  }
}

</mosaic_0001>

<bundles_post_ra>
// kernel: tpu_custom_call.1
= control target key start
LH: loop header
LB: loop body
LE: loop exit
PB: predicated region body
PF: predicated region fallthrough
CT: control target
= control target key end

     0   :  { %12 = vsyncpa [#allocation6], 0  ;;  %s473_s0 = inlined_call_operand.<no memory space> [shape: f32[1,1], index: 0, kind: input, shape index: {}]   ;;  %s474_s1 = inlined_call_operand.hbm [shape: f32[16,128], index: 1, kind: input, shape index: {}]   ;;  %s475_s2 = inlined_call_operand.hbm [shape: f32[16,128], index: 2, kind: input, shape index: {}]   ;;  %s476_s3 = inlined_call_operand.hbm [shape: f32[16,128], index: 3, kind: input, shape index: {}]   ;;  %s477_s4 = inlined_call_operand.hbm [shape: f32[1,8,128], index: 4, kind: output, shape index: {0}]   ;;  %s478_s5 = inlined_call_operand.hbm [shape: f32[1,8,128], index: 5, kind: output, shape index: {1}]  }
   0x1   :  { %13 = vsyncpa [#allocation9], 0 }
   0x2   :  { %14 = vsyncpa [#allocation7], 0 }
   0x3   :  { %15 = vsyncpa [#allocation13], 0  ;;  %s339_s18 = smov [#allocation8]   ;;  %s340_s20 = smov [#allocation5]  }
   0x4   :  { %s47_s19 = sshll.u32 %s339_s18, 4  ;;  %s29_s21 = sshll.u32 %s340_s20, 4  ;;  %s48_s19 = int_to_ptr.vmem [resolvable:$true] %s47_s19  ;;  %s376_s21 = int_to_ptr.vmem [resolvable:$true] %s29_s21 }
   0x5   :  { %s221_s24 = scalar_lea.hbm %s475_s2, 256 }
   0x6   :  { %p222_p0 = scmp.ne.s32.totalorder %s475_s2, %s221_s24  ;;  %p225_p1 = scmp.lt.u32.totalorder %s221_s24, %s475_s2 }
   0x8   :  { %p227_p2 = pnand %p225_p1, %p222_p0 }
   0xa   :  { %230 = shalt.err (!%p227_p2)
}
   0xb   :  { %s231_s29 = scalar_lea.vmem %s48_s19, 256  ;;  %p236_p4 = scmp.lt.s32.totalorder %s48_s19, %s48_s19 }
   0xc   :  { %p232_p3 = scmp.ne.s32.totalorder %s48_s19, %s231_s29  ;;  %p237_p5 = scmp.lt.s32.totalorder %s231_s29, %s231_s29 }
   0xe   :  { %p238_p6 = por %p237_p5, %p236_p4 }
  0x10   :  { %p239_p7 = pnand %p238_p6, %p232_p3 }
  0x12   :  { %242 = shalt.err (!%p239_p7)
}
  0x13   :  { %s341_s30 = smov 128   ;;  %s342_s6 = smov 8  }
  0x14   :  { %53 = dma.hbm_to_vmem [thread:$0]  %s475_s2, 256, %s48_s19, [#allocation9], %s341_s30, %s341_s30, %s342_s6  }
  0x15   :  { %s243_s11 = scalar_lea.hbm %s474_s1, 256 }
  0x16   :  { %p244_p8 = scmp.ne.s32.totalorder %s474_s1, %s243_s11  ;;  %p247_p9 = scmp.lt.u32.totalorder %s243_s11, %s474_s1 }
  0x18   :  { %p249_p10 = pnand %p247_p9, %p244_p8 }
  0x1a   :  { %252 = shalt.err (!%p249_p10)
}
  0x1b   :  { %s253_s16 = scalar_lea.vmem %s376_s21, 256  ;;  %p258_p12 = scmp.lt.s32.totalorder %s376_s21, %s376_s21 }
  0x1c   :  { %p254_p11 = scmp.ne.s32.totalorder %s376_s21, %s253_s16  ;;  %p259_p13 = scmp.lt.s32.totalorder %s253_s16, %s253_s16 }
  0x1e   :  { %p260_p0 = por %p259_p13, %p258_p12 }
  0x20   :  { %p261_p1 = pnand %p260_p0, %p254_p11 }
  0x22   :  { %264 = shalt.err (!%p261_p1)
}
  0x23   :  { %35 = dma.hbm_to_vmem [thread:$0]  %s474_s1, 256, %s376_s21, [#allocation6], %s341_s30, %s341_s30, %s342_s6  }
  0x24   :  { %s343_s18 = smov [#allocation10]   ;;  %s265_s23 = scalar_lea.hbm %s476_s3, 256 }
  0x25   :  { %s65_s19 = sshll.u32 %s343_s18, 4  ;;  %p266_p2 = scmp.ne.s32.totalorder %s476_s3, %s265_s23  ;;  %s66_s19 = int_to_ptr.vmem [resolvable:$true] %s65_s19 }
  0x26   :  { %p269_p3 = scmp.lt.u32.totalorder %s265_s23, %s476_s3 }
  0x28   :  { %p271_p4 = pnand %p269_p3, %p266_p2 }
  0x2a   :  { %274 = shalt.err (!%p271_p4)
}
  0x2b   :  { %s275_s28 = scalar_lea.vmem %s66_s19, 256  ;;  %p280_p6 = scmp.lt.s32.totalorder %s66_s19, %s66_s19 }
  0x2c   :  { %p276_p5 = scmp.ne.s32.totalorder %s66_s19, %s275_s28  ;;  %p281_p7 = scmp.lt.s32.totalorder %s275_s28, %s275_s28 }
  0x2e   :  { %p282_p8 = por %p281_p7, %p280_p6 }
  0x30   :  { %p283_p9 = pnand %p282_p8, %p276_p5 }
  0x32   :  { %286 = shalt.err (!%p283_p9)
}
  0x33   :  { %71 = dma.hbm_to_vmem [thread:$0]  %s476_s3, 256, %s66_s19, [#allocation9], %s341_s30, %s341_s30, %s342_s6  }
  0x34   :  { %331 = dma.done.wait [#allocation6], 256  }
  0x35   :  { %332 = vsyncadd [#allocation6], 4294967040 }
  0x36   :  { %333 = dma.done.wait [#allocation9], 512  }
  0x37   :  { %334 = vsyncadd [#allocation9], 4294966784  ;;  %v428_v0 = vld [vmem:[#allocation5] sm:$0xff]  ;;  %v430_v1 = vld [vmem:[#allocation5 + $0x8] sm:$0xff]  ;;  %s344_s29 = smov [#allocation12]  }
  0x38   :  { %v106_v2 = vand.u32 2147483647, %v428_v0  ;;  %v107_v3 = vand.u32 2147483647, %v430_v1  ;;  %s185_s7 = sshll.u32 %s344_s29, 4  ;;  %v434_v5 = vld [vmem:[#allocation10] sm:$0xff]  ;;  %s186_s7 = int_to_ptr.vmem [resolvable:$true] %s185_s7 }
  0x39   :  { %v436_v6 = vld [vmem:[#allocation10 + $0x8] sm:$0xff]  ;;  %s287_s3 = scalar_lea.vmem %s186_s7, 128  ;;  %p292_p11 = scmp.lt.s32.totalorder %s186_s7, %s186_s7 }
  0x3a   :  { %v108_v4 = vsub.f32 0.0, %v106_v2  ;;  %v109_v7 = vsub.f32 0.0, %v107_v3  ;;  %v159_v9 = vadd.f32 %v436_v6, %v434_v5  ;;  %p288_p10 = scmp.ne.s32.totalorder %s186_s7, %s287_s3  ;;  %p293_p12 = scmp.lt.s32.totalorder %s287_s3, %s287_s3 }
  0x3c   :  { %v110_v8 = vmul.f32 1.442695, %v108_v4  ;;  %v112_v10 = vmul.f32 1.442695, %v109_v7  ;;  %168 = vst [vmem:[#allocation12] sm:$0xff] %v159_v9  ;;  %p294_p13 = por %p293_p12, %p292_p11 }
  0x3e   :  { %213 = vpow2.f32 %v110_v8  ;;  %p295_p0 = pnand %p294_p13, %p288_p10 }
  0x3f   :  { %215 = vpow2.f32 %v112_v10 }
  0x40   :  { %298 = shalt.err (!%p295_p0)
}
  0x41   :  { %s299_s8 = scalar_lea.hbm %s478_s5, 128 }
  0x42   :  { %p300_p1 = scmp.ne.s32.totalorder %s478_s5, %s299_s8  ;;  %p303_p2 = scmp.lt.u32.totalorder %s299_s8, %s478_s5 }
  0x44   :  { %p305_p3 = pnand %p303_p2, %p300_p1 }
  0x46   :  { %308 = shalt.err (!%p305_p3)
}
  0x47   :  { %188 = dma.vmem_to_hbm [thread:$0]  %s186_s7, 128, %s478_s5, [#allocation13]   ;;  %v101_v17 = vld [vmem:[#allocation8] sm:$0xff]  ;;  %v102_v20 = vld [vmem:[#allocation8 + $0x8] sm:$0xff]  ;;  %v132_v23 = vsub.f32 0.0, %v428_v0  ;;  %v133_v25 = vsub.f32 0.0, %v430_v1 }
  0x48   :  { %v214_v11 = vpop.eup %213  ;;  %s205_s2 = sadd.f32 -1.0, %s473_s0  ;;  %v138_v32 = vsub.f32 1.0, %v101_v17  ;;  %v139_v36 = vsub.f32 1.0, %v102_v20  ;;  %s345_s0 = smov [#allocation11]  }
  0x49   :  { %v216_v12 = vpop.eup %215  ;;  %v114_v13 = vadd.f32 1.0, %v214_v11  ;;  %v117_v15 = vmul.f32 -0.5, %v214_v11  ;;  %v120_v21 = vand.u32 2147483647, %v214_v11  ;;  %v134_v31 = vmax.f32 %v132_v23, 0.0  ;;  %s175_s5 = sshll.u32 %s345_s0, 4  ;;  %s176_s5 = int_to_ptr.vmem [resolvable:$true] %s175_s5 }
  0x4a   :  { %v123_v14 = vadd.f32 1.0, %v216_v12  ;;  %v126_v16 = vmul.f32 -0.5, %v216_v12  ;;  %v143_v19 = vstv %s205_s2  ;;  %v129_v24 = vand.u32 2147483647, %v216_v12  ;;  %s309_s17 = scalar_lea.vmem %s176_s5, 128  ;;  %p314_p5 = scmp.lt.s32.totalorder %s176_s5, %s176_s5 }
  0x4b   :  { %217 = vlog2.f32 %v114_v13  ;;  %v118_v18 = vadd.f32 1.0, %v117_v15  ;;  %v144_v26 = vmul.f32 %v143_v19, %v101_v17  ;;  %v145_v28 = vmul.f32 %v143_v19, %v102_v20  ;;  %p310_p4 = scmp.ne.s32.totalorder %s176_s5, %s309_s17  ;;  %p315_p6 = scmp.lt.s32.totalorder %s309_s17, %s309_s17 }
  0x4c   :  { %219 = vlog2.f32 %v123_v14  ;;  %v127_v22 = vadd.f32 1.0, %v126_v16  ;;  %vm121_vm0 = vcmp.lt.f32.partialorder %v120_v21, 0.0004427343  ;;  %vm130_vm1 = vcmp.lt.f32.partialorder %v129_v24, 0.0004427343 }
  0x4d   :  { %v119_v27 = vmul.f32 %v214_v11, %v118_v18  ;;  %v135_v35 = vmax.f32 %v133_v25, 0.0  ;;  %v146_v38 = vadd.f32 1.0, %v144_v26  ;;  %v147_v40 = vadd.f32 1.0, %v145_v28  ;;  %p316_p7 = por %p315_p6, %p314_p5 }
  0x4e   :  { %v128_v30 = vmul.f32 %v216_v12, %v127_v22  ;;  %v140_v43 = vmul.f32 %v138_v32, %v428_v0  ;;  %v141_v45 = vmul.f32 %v139_v36, %v430_v1 }
  0x4f   :  { %p317_p8 = pnand %p316_p7, %p310_p4 }
  0x55   :  { %v218_v29 = vpop.eup %217 }
  0x56   :  { %v220_v33 = vpop.eup %219  ;;  %v116_v34 = vmul.f32 0.6931472, %v218_v29 }
  0x57   :  { %v125_v37 = vmul.f32 0.6931472, %v220_v33 }
  0x58   :  { %v122_v39 = vsel %vm121_vm0, %v119_v27, %v116_v34 }
  0x59   :  { %v131_v41 = vsel %vm130_vm1, %v128_v30, %v125_v37  ;;  %v136_v42 = vadd.f32 %v134_v31, %v122_v39 }
  0x5a   :  { %v137_v44 = vadd.f32 %v135_v35, %v131_v41 }
  0x5b   :  { %v148_v46 = vmul.f32 %v146_v38, %v136_v42 }
  0x5c   :  { %v149_v47 = vmul.f32 %v147_v40, %v137_v44 }
  0x5d   :  { %v150_v48 = vadd.f32 %v148_v46, %v140_v43 }
  0x5e   :  { %v151_v49 = vadd.f32 %v149_v47, %v141_v45 }
  0x5f   :  { %v152_v50 = vmul.f32 %v150_v48, %v434_v5 }
  0x60   :  { %v153_v51 = vmul.f32 %v151_v49, %v436_v6 }
  0x62   :  { %v155_v52 = vadd.f32 %v153_v51, %v152_v50 }
  0x64   :  { %166 = vst [vmem:[#allocation11] sm:$0xff] %v155_v52 }
  0x65   :  { %320 = shalt.err (!%p317_p8)
}
  0x66   :  { %s321_s20 = scalar_lea.hbm %s477_s4, 128 }
  0x67   :  { %p322_p9 = scmp.ne.s32.totalorder %s477_s4, %s321_s20  ;;  %p325_p10 = scmp.lt.u32.totalorder %s321_s20, %s477_s4 }
  0x69   :  { %p327_p11 = pnand %p325_p10, %p322_p9 }
  0x6b   :  { %330 = shalt.err (!%p327_p11)
}
  0x6c   :  { %178 = dma.vmem_to_hbm [thread:$0]  %s176_s5, 128, %s477_s4, [#allocation7]  }
  0x6d   :  { %335 = dma.done.wait [#allocation7], 128  }
  0x6e   :  { %336 = vsyncadd [#allocation7], 4294967168 }
  0x6f   :  { %337 = dma.done.wait [#allocation13], 128  }
  0x70   :  { %338 = vsyncadd [#allocation13], 4294967168 }
  0x71   :  { %195 = vsyncpa [#allocation6], 1 }
  0x72   :  { %196 = vsyncpa [#allocation9], 1 }
  0x73   :  { %197 = vsyncpa [#allocation7], 1 }
  0x74   :  { %198 = vsyncpa [#allocation13], 1 }

</bundles_post_ra>
